<compile_context>
chip_gen: v7x
topology: tpu7x:2x2x1
jax: 0.10.0
libtpu: 0.0.40
codegen_flags: <defaults>
</compile_context>

<pallas_src>
import functools
import math

import jax
import jax.numpy as jnp
import numpy as np
from jax import lax
from jax.experimental import pallas as pl
from jax.experimental.pallas import tpu as pltpu

_LANES = 128
_SUBLANES = 8
_MAX_TILE_ROWS = 4096        # (4096,128) f32 = 2 MiB per stream per buffer
_GROUP_ROWS = 64             # in-kernel row group: keeps live values in vregs
_GROUP_UNROLL = 2
_NUM_SPLITS = 2              # leading "parallel" grid axis (v7x megacore)
_VMEM_LIMIT = 32 * 1024 * 1024   # v5e scoped default is only 16 MiB


def _cdiv(a, b):
    return (a + b - 1) // b


def _distill_kernel(s_ref, t_ref, g_ref, *rest, rows, tile_rows,
                    tiles_per_split, has_mask, edge_possible,
                    overrun_possible):
    if has_mask:
        m_ref, out_t_ref, out_g_ref = rest
    else:
        out_t_ref, out_g_ref = rest
        m_ref = None

    p = pl.program_id(0)                 # parallel split axis
    i = pl.program_id(1)                 # arbitrary (reduction) axis
    row_base = (p * tiles_per_split + i) * tile_rows

    # Output blocks are resident across the reduction axis: init at i == 0.
    @pl.when(i == 0)
    def _():
        out_t_ref[...] = jnp.zeros_like(out_t_ref)
        out_g_ref[...] = jnp.zeros_like(out_g_ref)

    def fold_rows(x):
        """(R,128) f32 -> (8,128) partial sums, via plain vreg adds."""
        r = x.shape[0]
        n8 = (r // _SUBLANES) * _SUBLANES
        acc = None
        if n8 > 0:
            acc = x[0:_SUBLANES]
            for r0 in range(_SUBLANES, n8, _SUBLANES):
                acc = acc + x[r0:r0 + _SUBLANES]
        if r > n8:  # tiny-input leftover (<8 rows): one cross-sublane reduce
            part = jnp.sum(x[n8:r], axis=0, keepdims=True)          # (1,128)
            row = lax.broadcasted_iota(jnp.int32, (_SUBLANES, _LANES), 0)
            emb = jnp.where(row == 0,
                            jnp.broadcast_to(part, (_SUBLANES, _LANES)),
                            jnp.zeros((_SUBLANES, _LANES), jnp.float32))
            acc = emb if acc is None else acc + emb
        return acc

    def chunk_sums(start, nrows, masked_edge, global_start):
        s = s_ref[pl.ds(start, nrows), :].astype(jnp.float32)
        t = t_ref[pl.ds(start, nrows), :].astype(jnp.float32)
        g = g_ref[pl.ds(start, nrows), :].astype(jnp.float32)
        dt = s - t
        dg = s - g
        if has_mask:
            m = m_ref[pl.ds(start, nrows), :].astype(jnp.float32)
            dt = dt * m          # (s*m - t*m) folded into (s - t) * m
            dg = dg * m
        if masked_edge:
            # Row-level validity only (lane-level never needed); select AFTER
            # all arithmetic so NaN/Inf garbage rows cannot leak through.
            local = lax.broadcasted_iota(jnp.int32, (nrows, _LANES), 0)
            valid = (global_start + local) < rows
            dt = jnp.where(valid, dt, 0.0)
            dg = jnp.where(valid, dg, 0.0)
        return fold_rows(dt * dt), fold_rows(dg * dg)

    n_full = tile_rows // _GROUP_ROWS
    rem = tile_rows % _GROUP_ROWS

    def accumulate(masked_edge):
        zero = jnp.zeros((_SUBLANES, _LANES), jnp.float32)
        acc_t, acc_g = zero, zero
        if n_full > 0:
            def body(j, carry):
                at, ag = carry
                start = pl.multiple_of(j * _GROUP_ROWS, _GROUP_ROWS)
                pt, pg = chunk_sums(start, _GROUP_ROWS, masked_edge,
                                    row_base + start)
                return at + pt, ag + pg
            unroll = _GROUP_UNROLL if n_full >= _GROUP_UNROLL else True
            acc_t, acc_g = lax.fori_loop(0, n_full, body, (acc_t, acc_g),
                                         unroll=unroll)
        if rem > 0:
            start = n_full * _GROUP_ROWS
            pt, pg = chunk_sums(start, rem, masked_edge, row_base + start)
            acc_t = acc_t + pt
            acc_g = acc_g + pg
        out_t_ref[...] += acc_t
        out_g_ref[...] += acc_g

    if not edge_possible and not overrun_possible:
        # Fully aligned case: no per-tile branching, no masking at all.
        accumulate(False)
    else:
        @pl.when(row_base + tile_rows <= rows)      # interior: no masking
        def _():
            accumulate(False)
        if edge_possible:
            @pl.when(jnp.logical_and(row_base < rows,
                                     row_base + tile_rows > rows))
            def _():
                accumulate(True)
        # Overrun tiles (row_base >= rows) contribute nothing and are skipped.


def _prefix_2d(x, rows):
    """Lane-dense (rows, 128) view of the aligned prefix (free when aligned)."""
    flat = jnp.reshape(x, (-1,))
    if rows * _LANES != flat.shape[0]:
        flat = flat[: rows * _LANES]
    return jnp.reshape(flat, (rows, _LANES))


@jax.jit
def distillation_loss(student_pred, teacher_pred, gt, alpha=0.5, mask=None):
    """Pallas implementation of DistillationLoss.forward."""
    if isinstance(alpha, (int, float)):
        assert 0.0 <= alpha <= 1.0, 'alpha must be in range [0, 1]'

    n = math.prod(student_pred.shape)
    assert n > 0, 'empty input'
    rows = n // _LANES
    tail = n - rows * _LANES
    has_mask = mask is not None
    if has_mask and mask.dtype == jnp.bool_:
        mask = mask.astype(student_pred.dtype)   # avoid streaming i1 blocks

    sum_t = jnp.float32(0.0)
    sum_g = jnp.float32(0.0)

    if rows > 0:
        inputs = [_prefix_2d(student_pred, rows),
                  _prefix_2d(teacher_pred, rows),
                  _prefix_2d(gt, rows)]
        if has_mask:
            inputs.append(_prefix_2d(mask, rows))

        if rows <= _MAX_TILE_ROWS:
            tile_rows = rows            # full-dim block: always layout-legal
            n_row_tiles = 1
        else:
            tile_rows = _MAX_TILE_ROWS  # multiple of (8,128) packing for all dtypes
            n_row_tiles = _cdiv(rows, tile_rows)
        num_splits = _NUM_SPLITS if n_row_tiles >= _NUM_SPLITS else 1
        tiles_per_split = _cdiv(n_row_tiles, num_splits)
        edge_possible = (rows % tile_rows) != 0
        overrun_possible = num_splits * tiles_per_split != n_row_tiles

        def in_map(p, i):
            tile = p * tiles_per_split + i
            # Clamp so DMAs never walk past the array; overrun tiles are
            # skipped inside the kernel (they contribute exactly zero).
            return (jnp.minimum(tile, n_row_tiles - 1), 0)

        tile_spec = pl.BlockSpec((tile_rows, _LANES), in_map)
        out_spec = pl.BlockSpec((_SUBLANES, _LANES), lambda p, i: (p, 0))
        out_shape = jax.ShapeDtypeStruct((num_splits * _SUBLANES, _LANES),
                                         jnp.float32)

        kernel = functools.partial(
            _distill_kernel, rows=rows, tile_rows=tile_rows,
            tiles_per_split=tiles_per_split, has_mask=has_mask,
            edge_possible=edge_possible, overrun_possible=overrun_possible)

        blk_t, blk_g = pl.pallas_call(
            kernel,
            out_shape=(out_shape, out_shape),
            grid_spec=pltpu.PrefetchScalarGridSpec(
                num_scalar_prefetch=0,
                grid=(num_splits, tiles_per_split),
                in_specs=[tile_spec] * len(inputs),
                out_specs=(out_spec, out_spec)),
            compiler_params=pltpu.CompilerParams(
                dimension_semantics=("parallel", "arbitrary"),
                vmem_limit_bytes=_VMEM_LIMIT),
        )(*inputs)

        sum_t = sum_t + jnp.sum(blk_t)
        sum_g = sum_g + jnp.sum(blk_g)

    if tail > 0:
        # Tiny (<128 element) unaligned tail in plain JAX: keeps the ragged
        # path at 1x HBM traffic (no zero-pad copy of the full tensors).
        off = rows * _LANES
        s_t = jnp.ravel(student_pred)[off:].astype(jnp.float32)
        t_t = jnp.ravel(teacher_pred)[off:].astype(jnp.float32)
        g_t = jnp.ravel(gt)[off:].astype(jnp.float32)
        dt = s_t - t_t
        dg = s_t - g_t
        if has_mask:
            m_t = jnp.ravel(mask)[off:].astype(jnp.float32)
            dt = dt * m_t
            dg = dg * m_t
        sum_t = sum_t + jnp.sum(dt * dt)
        sum_g = sum_g + jnp.sum(dg * dg)

    inv_n = jnp.float32(1.0 / n)
    alpha = jnp.asarray(alpha, jnp.float32)
    return alpha * (sum_t * inv_n) + (1.0 - alpha) * (sum_g * inv_n)


def _reference(student, teacher, gt, alpha, mask):
    student = student.astype(jnp.float32)
    teacher = teacher.astype(jnp.float32)
    gt = gt.astype(jnp.float32)
    if mask is not None:
        mask = mask.astype(jnp.float32)
        student = student * mask
        teacher = teacher * mask
        gt = gt * mask
    teacher_loss = jnp.mean((student - teacher) ** 2)
    gt_loss = jnp.mean((student - gt) ** 2)
    return alpha * teacher_loss + (1.0 - alpha) * gt_loss


if __name__ == "__main__":
    key = jax.random.PRNGKey(0)
    k1, k2, k3, k4 = jax.random.split(key, 4)

    # 1) NCHW-shaped predictions / ground truth (lane-aligned fast path).
    shape = (2, 4, 16, 16)
    student = jax.random.normal(k1, shape, jnp.float32)
    teacher = jax.random.normal(k2, shape, jnp.float32)
    gt = jax.random.normal(k3, shape, jnp.float32)
    mask = (jax.random.uniform(k4, shape) > 0.3).astype(jnp.float32)
    alpha = 0.3

    out_masked = jax.block_until_ready(
        distillation_loss(student, teacher, gt, alpha=alpha, mask=mask))
    ref_masked = _reference(student, teacher, gt, alpha, mask)
    assert np.allclose(np.asarray(out_masked), np.asarray(ref_masked),
                       rtol=1e-5, atol=1e-6), (out_masked, ref_masked)

    # 2) Without mask (compiles out the mask stream entirely).
    out_plain = jax.block_until_ready(
        distillation_loss(student, teacher, gt, alpha=alpha, mask=None))
    ref_plain = _reference(student, teacher, gt, alpha, None)
    assert np.allclose(np.asarray(out_plain), np.asarray(ref_plain),
                       rtol=1e-5, atol=1e-6), (out_plain, ref_plain)

    # 3) bf16 + ragged element count: in-kernel upcast, aligned-prefix kernel
    #    + plain-JAX tail, sub-8-row tile.
    rshape = (2, 3, 7, 11)
    rs = jax.random.normal(k1, rshape, jnp.float32).astype(jnp.bfloat16)
    rt = jax.random.normal(k2, rshape, jnp.float32).astype(jnp.bfloat16)
    rg = jax.random.normal(k3, rshape, jnp.float32).astype(jnp.bfloat16)
    out_ragged = jax.block_until_ready(
        distillation_loss(rs, rt, rg, alpha=0.7, mask=None))
    ref_ragged = _reference(rs, rt, rg, 0.7, None)
    assert np.allclose(np.asarray(out_ragged), np.asarray(ref_ragged),
                       rtol=1e-5, atol=1e-6), (out_ragged, ref_ragged)

    # 4) Coverage check for the multi-tile path: 2 row tiles -> parallel
    #    split, inner fori_loop, clamped index_map and the edge-masked tile.
    bshape = (8, 8, 96, 96)   # 589824 elems -> 4608 rows > 4096
    bs = jax.random.normal(k1, bshape, jnp.float32)
    bt = jax.random.normal(k2, bshape, jnp.float32)
    bg = jax.random.normal(k3, bshape, jnp.float32)
    bm = (jax.random.uniform(k4, bshape) > 0.5).astype(jnp.float32)
    out_big = jax.block_until_ready(
        distillation_loss(bs, bt, bg, alpha=0.25, mask=bm))
    ref_big = _reference(bs, bt, bg, 0.25, bm)
    assert np.allclose(np.asarray(out_big), np.asarray(ref_big),
                       rtol=1e-4, atol=1e-6), (out_big, ref_big)

    print("KERNEL_OK")
</pallas_src>

<mosaic_0001>
module attributes {stable_mosaic.version = 11 : i64} {
  func.func @_distill_kernel(%arg0: i32, %arg1: i32, %arg2: memref<16x128xf32, #tpu.memory_space<vmem>>, %arg3: memref<16x128xf32, #tpu.memory_space<vmem>>, %arg4: memref<16x128xf32, #tpu.memory_space<vmem>>, %arg5: memref<16x128xf32, #tpu.memory_space<vmem>>, %arg6: memref<8x128xf32, #tpu.memory_space<vmem>>, %arg7: memref<8x128xf32, #tpu.memory_space<vmem>>) attributes {dimension_semantics = [#tpu.dimension_semantics<parallel>, #tpu.dimension_semantics<arbitrary>], iteration_bounds = array<i64: 1, 1>, scalar_prefetch = 0 : i64, scratch_operands = 0 : i64, tpu.core_type = #tpu.core_type<tc>, window_params = [{transform_indices = @transform_0, window_bounds = array<i64: 16, 128>}, {transform_indices = @transform_1, window_bounds = array<i64: 16, 128>}, {transform_indices = @transform_2, window_bounds = array<i64: 16, 128>}, {transform_indices = @transform_3, window_bounds = array<i64: 16, 128>}, {transform_indices = @transform_4, window_bounds = array<i64: 8, 128>}, {transform_indices = @transform_5, window_bounds = array<i64: 8, 128>}]} {
    %c0_i32 = arith.constant 0 : i32
    %0 = arith.cmpi eq, %arg1, %c0_i32 : i32
    %1 = arith.extui %0 : i1 to i32
    %c0_i32_0 = arith.constant 0 : i32
    %2 = arith.cmpi ne, %1, %c0_i32_0 : i32
    scf.if %2 {
      %cst_16 = arith.constant 0.000000e+00 : f32
      %28 = vector.broadcast %cst_16 : f32 to vector<8x128xf32>
      %c0_17 = arith.constant 0 : index
      %c0_18 = arith.constant 0 : index
      %29 = vector.load %arg6[%c0_17, %c0_18] : memref<8x128xf32, #tpu.memory_space<vmem>>, vector<8x128xf32>
      tpu.vector_store %arg6[%c0_17, %c0_18], %28 {strides = array<i32>} : memref<8x128xf32, #tpu.memory_space<vmem>>, vector<8x128xf32>,
      %cst_19 = arith.constant 0.000000e+00 : f32
      %30 = vector.broadcast %cst_19 : f32 to vector<8x128xf32>
      %c0_20 = arith.constant 0 : index
      %c0_21 = arith.constant 0 : index
      %31 = vector.load %arg7[%c0_20, %c0_21] : memref<8x128xf32, #tpu.memory_space<vmem>>, vector<8x128xf32>
      tpu.vector_store %arg7[%c0_20, %c0_21], %30 {strides = array<i32>} : memref<8x128xf32, #tpu.memory_space<vmem>>, vector<8x128xf32>,
    } else {
    }
    %cst = arith.constant 0.000000e+00 : f32
    %3 = vector.broadcast %cst : f32 to vector<8x128xf32>
    %c0 = arith.constant 0 : index
    %c0_1 = arith.constant 0 : index
    %4 = vector.load %arg2[%c0, %c0_1] : memref<16x128xf32, #tpu.memory_space<vmem>>, vector<16x128xf32>
    %c0_2 = arith.constant 0 : index
    %c0_3 = arith.constant 0 : index
    %5 = vector.load %arg3[%c0_2, %c0_3] : memref<16x128xf32, #tpu.memory_space<vmem>>, vector<16x128xf32>
    %c0_4 = arith.constant 0 : index
    %c0_5 = arith.constant 0 : index
    %6 = vector.load %arg4[%c0_4, %c0_5] : memref<16x128xf32, #tpu.memory_space<vmem>>, vector<16x128xf32>
    %7 = arith.subf %4, %5 : vector<16x128xf32>
    %8 = arith.subf %4, %6 : vector<16x128xf32>
    %c0_6 = arith.constant 0 : index
    %c0_7 = arith.constant 0 : index
    %9 = vector.load %arg5[%c0_6, %c0_7] : memref<16x128xf32, #tpu.memory_space<vmem>>, vector<16x128xf32>
    %10 = arith.mulf %7, %9 : vector<16x128xf32>
    %11 = arith.mulf %8, %9 : vector<16x128xf32>
    %12 = arith.mulf %10, %10 : vector<16x128xf32>
    %13 = vector.extract_strided_slice %12 {offsets = [0, 0], sizes = [8, 128], strides = [1, 1]} : vector<16x128xf32> to vector<8x128xf32>
    %14 = vector.extract_strided_slice %12 {offsets = [8, 0], sizes = [8, 128], strides = [1, 1]} : vector<16x128xf32> to vector<8x128xf32>
    %15 = arith.addf %13, %14 : vector<8x128xf32>
    %16 = arith.mulf %11, %11 : vector<16x128xf32>
    %17 = vector.extract_strided_slice %16 {offsets = [0, 0], sizes = [8, 128], strides = [1, 1]} : vector<16x128xf32> to vector<8x128xf32>
    %18 = vector.extract_strided_slice %16 {offsets = [8, 0], sizes = [8, 128], strides = [1, 1]} : vector<16x128xf32> to vector<8x128xf32>
    %19 = arith.addf %17, %18 : vector<8x128xf32>
    %20 = arith.addf %3, %15 : vector<8x128xf32>
    %21 = arith.addf %3, %19 : vector<8x128xf32>
    %c0_8 = arith.constant 0 : index
    %c0_9 = arith.constant 0 : index
    %22 = vector.load %arg6[%c0_8, %c0_9] : memref<8x128xf32, #tpu.memory_space<vmem>>, vector<8x128xf32>
    %23 = arith.addf %22, %20 : vector<8x128xf32>
    %c0_10 = arith.constant 0 : index
    %c0_11 = arith.constant 0 : index
    %24 = vector.load %arg6[%c0_10, %c0_11] : memref<8x128xf32, #tpu.memory_space<vmem>>, vector<8x128xf32>
    tpu.vector_store %arg6[%c0_10, %c0_11], %23 {strides = array<i32>} : memref<8x128xf32, #tpu.memory_space<vmem>>, vector<8x128xf32>,
    %c0_12 = arith.constant 0 : index
    %c0_13 = arith.constant 0 : index
    %25 = vector.load %arg7[%c0_12, %c0_13] : memref<8x128xf32, #tpu.memory_space<vmem>>, vector<8x128xf32>
    %26 = arith.addf %25, %21 : vector<8x128xf32>
    %c0_14 = arith.constant 0 : index
    %c0_15 = arith.constant 0 : index
    %27 = vector.load %arg7[%c0_14, %c0_15] : memref<8x128xf32, #tpu.memory_space<vmem>>, vector<8x128xf32>
    tpu.vector_store %arg7[%c0_14, %c0_15], %26 {strides = array<i32>} : memref<8x128xf32, #tpu.memory_space<vmem>>, vector<8x128xf32>,
    return
  }
  func.func @transform_0(%arg0: i32, %arg1: i32) -> (i32, i32) {
    %c1_i32 = arith.constant 1 : i32
    %0 = arith.muli %arg0, %c1_i32 : i32
    %1 = arith.addi %0, %arg1 : i32
    %c0_i32 = arith.constant 0 : i32
    %2 = arith.minsi %1, %c0_i32 : i32
    %c0_i32_0 = arith.constant 0 : i32
    %c0_i32_1 = arith.constant 0 : i32
    return %2, %c0_i32_0 : i32, i32
  }
  func.func @transform_1(%arg0: i32, %arg1: i32) -> (i32, i32) {
    %c1_i32 = arith.constant 1 : i32
    %0 = arith.muli %arg0, %c1_i32 : i32
    %1 = arith.addi %0, %arg1 : i32
    %c0_i32 = arith.constant 0 : i32
    %2 = arith.minsi %1, %c0_i32 : i32
    %c0_i32_0 = arith.constant 0 : i32
    %c0_i32_1 = arith.constant 0 : i32
    return %2, %c0_i32_0 : i32, i32
  }
  func.func @transform_2(%arg0: i32, %arg1: i32) -> (i32, i32) {
    %c1_i32 = arith.constant 1 : i32
    %0 = arith.muli %arg0, %c1_i32 : i32
    %1 = arith.addi %0, %arg1 : i32
    %c0_i32 = arith.constant 0 : i32
    %2 = arith.minsi %1, %c0_i32 : i32
    %c0_i32_0 = arith.constant 0 : i32
    %c0_i32_1 = arith.constant 0 : i32
    return %2, %c0_i32_0 : i32, i32
  }
  func.func @transform_3(%arg0: i32, %arg1: i32) -> (i32, i32) {
    %c1_i32 = arith.constant 1 : i32
    %0 = arith.muli %arg0, %c1_i32 : i32
    %1 = arith.addi %0, %arg1 : i32
    %c0_i32 = arith.constant 0 : i32
    %2 = arith.minsi %1, %c0_i32 : i32
    %c0_i32_0 = arith.constant 0 : i32
    %c0_i32_1 = arith.constant 0 : i32
    return %2, %c0_i32_0 : i32, i32
  }
  func.func @transform_4(%arg0: i32, %arg1: i32) -> (i32, i32) {
    %c0_i32 = arith.constant 0 : i32
    %c0_i32_0 = arith.constant 0 : i32
    return %arg0, %c0_i32 : i32, i32
  }
  func.func @transform_5(%arg0: i32, %arg1: i32) -> (i32, i32) {
    %c0_i32 = arith.constant 0 : i32
    %c0_i32_0 = arith.constant 0 : i32
    return %arg0, %c0_i32 : i32, i32
  }
}

</mosaic_0001>

<bundles_post_ra>
// kernel: distillation_loss.1
= control target key start
LH: loop header
LB: loop body
LE: loop exit
PB: predicated region body
PF: predicated region fallthrough
CT: control target
= control target key end

     0   :  { %s276_s0 = inlined_call_operand.vmem [shape: f32[16,128], index: 0, kind: input, shape index: {}]   ;;  %s277_s1 = inlined_call_operand.vmem [shape: f32[16,128], index: 1, kind: input, shape index: {}]   ;;  %s278_s3 = inlined_call_operand.vmem [shape: f32[16,128], index: 3, kind: input, shape index: {}]   ;;  %s279_s2 = inlined_call_operand.vmem [shape: f32[16,128], index: 2, kind: input, shape index: {}]   ;;  %s280_s4 = inlined_call_operand.vmem [shape: f32[8,128], index: 4, kind: output, shape index: {0}]   ;;  %s281_s5 = inlined_call_operand.vmem [shape: f32[8,128], index: 5, kind: output, shape index: {1}]  }
   0x1   :  { %v153_v0 = vld [vmem:[%s276_s0] sm:$0xff]  ;;  %v154_v1 = vld [vmem:[%s276_s0 + $0x8] sm:$0xff] }
   0x2   :  { %v155_v2 = vld [vmem:[%s277_s1] sm:$0xff]  ;;  %v156_v3 = vld [vmem:[%s277_s1 + $0x8] sm:$0xff] }
   0x3   :  { %v159_v4 = vsub.f32 %v153_v0, %v155_v2  ;;  %v163_v5 = vld [vmem:[%s278_s3] sm:$0xff]  ;;  %v164_v6 = vld [vmem:[%s278_s3 + $0x8] sm:$0xff]  ;;  %v160_v7 = vsub.f32 %v154_v1, %v156_v3 }
   0x4   :  { %v157_v8 = vld [vmem:[%s279_s2] sm:$0xff]  ;;  %v158_v9 = vld [vmem:[%s279_s2 + $0x8] sm:$0xff] }
   0x5   :  { %v165_v10 = vmul.f32 %v163_v5, %v159_v4  ;;  %v161_v11 = vsub.f32 %v153_v0, %v157_v8  ;;  %v162_v12 = vsub.f32 %v154_v1, %v158_v9  ;;  %v166_v13 = vmul.f32 %v164_v6, %v160_v7 }
   0x7   :  { %v169_v14 = vmul.f32 %v165_v10, %v165_v10  ;;  %v167_v15 = vmul.f32 %v163_v5, %v161_v11  ;;  %v168_v16 = vmul.f32 %v164_v6, %v162_v12  ;;  %v170_v17 = vmul.f32 %v166_v13, %v166_v13 }
   0x9   :  { %v172_v18 = vmul.f32 %v167_v15, %v167_v15  ;;  %v173_v19 = vmul.f32 %v168_v16, %v168_v16  ;;  %v171_v20 = vadd.f32 %v170_v17, %v169_v14 }
   0xb   :  { %v174_v21 = vadd.f32 %v173_v19, %v172_v18  ;;  %179 = vst [vmem:[%s280_s4] sm:$0xff] %v171_v20 }
   0xd   :  { %182 = vst [vmem:[%s281_s5] sm:$0xff] %v174_v21 }

</bundles_post_ra>
